<compile_context>
chip_gen: v5e
topology: v5e:2x2
jax: 0.10.0
libtpu: 0.0.40
codegen_flags: <defaults>
</compile_context>

<pallas_src>
import functools
import numpy as np
import jax
import jax.numpy as jnp
from jax import lax
from jax.experimental import pallas as pl
from jax.experimental.pallas import tpu as pltpu

LANE = 128
TQ_TARGET = 1024   # lane-tile target (>=512 amortizes the ~0.35us per-step overhead)


def _kernel(p_ref, w_ref, o_ref, *, tq):
    # conv + BN(scale,shift) + 0.25 pool-scale as ONE im2col matmul
    # (bf16 operands, f32 accumulate); the bias rides on the ones-row of the patches.
    y = jnp.dot(w_ref[...], p_ref[...], preferred_element_type=jnp.float32)  # (Cout, 4*TQ) f32
    y = jnp.maximum(y, 0.0)                                                  # fused ReLU (VPU, f32)
    # anti-aliasing AvgPool2d(2): the four taps are contiguous, lane-aligned TQ chunks
    o_ref[...] = (y[:, 0 * tq:1 * tq] + y[:, 1 * tq:2 * tq]
                  + y[:, 2 * tq:3 * tq] + y[:, 3 * tq:4 * tq])


@functools.partial(jax.jit, static_argnames=("eps",))
def conv_norm_act_aa(x_nchw, w_oihw, gamma, beta, running_mean, running_var,
                     *, eps=1e-5):
    """ConvNormActAa forward (inference semantics for BatchNorm)."""
    N, Cin, H, W = x_nchw.shape
    Cout, _, KH, KW = w_oihw.shape
    pad = 1                              # timm get_padding(k=3, stride=1, dil=1) == 1
    assert H % 2 == 0 and W % 2 == 0, "AvgPool2d(2) path assumes even spatial dims"
    Ho, Wo = H // 2, W // 2
    Q = N * Ho * Wo                      # pooled pixels (lane axis)
    KKC = KH * KW * Cin
    KKCa = KKC + 1                       # + ones-row for the folded bias

    TQ = min(TQ_TARGET, pl.cdiv(Q, LANE) * LANE)   # lane tile, multiple of 128
    Q_pad = pl.cdiv(Q, TQ) * TQ
    nT = Q_pad // TQ

    # -------- glue (one jit): layout, im2col, constant folding --------
    # cast BEFORE the 9x im2col expansion: halves the bytes the glue moves
    x = jnp.transpose(x_nchw, (0, 2, 3, 1)).astype(jnp.bfloat16)            # NHWC bf16
    xp = jnp.pad(x, ((0, 0), (pad, pad), (pad, pad), (0, 0)))
    # im2col: (N, H, W, KH*KW*Cin), feature order (kh, kw, c)
    cols = [xp[:, kh:kh + H, kw:kw + W, :] for kh in range(KH) for kw in range(KW)]
    patches = jnp.concatenate(cols, axis=-1)
    # stride-1 conv pixel (h, w) = (2*ho+r, 2*wo+s) -> pool tap t = (r, s); put the
    # contraction dim first so the matmul output is channel-major and lane-dense.
    p = patches.reshape(N, Ho, 2, Wo, 2, KKC)
    p = jnp.transpose(p, (5, 2, 4, 0, 1, 3)).reshape(KKC, 4, Q)             # (KKC, tap, q=(n,ho,wo))
    p = jnp.pad(p, ((0, 0), (0, 0), (0, Q_pad - Q)))                        # lane-align Q
    p = jnp.concatenate([p, jnp.ones((1, 4, Q_pad), jnp.bfloat16)], axis=0)  # bias row -> (KKCa,4,Q_pad)
    # column order (q_tile, tap, q_within_tile): taps contiguous inside every lane tile
    patches_t = jnp.transpose(p.reshape(KKCa, 4, nT, TQ),
                              (0, 2, 1, 3)).reshape(KKCa, nT * 4 * TQ)

    # Fold BN scale, BN shift and the AvgPool 1/4 into the matmul constants.
    scale = gamma / jnp.sqrt(running_var + eps)
    shift = beta - running_mean * scale
    w_mat = jnp.transpose(w_oihw, (0, 2, 3, 1)).reshape(Cout, KKC) * scale[:, None]
    w_aug = (0.25 * jnp.concatenate([w_mat, shift[:, None]], axis=1)
             ).astype(jnp.bfloat16)                                         # (Cout, KKCa)
    # TODO(synk): training-mode BatchNorm (batch statistics) not modeled; eval-mode only.

    cost = pl.CostEstimate(
        flops=2 * Cout * KKCa * 4 * Q_pad,
        transcendentals=0,
        bytes_accessed=KKCa * 4 * Q_pad * 2 + Cout * KKCa * 2 + Cout * Q_pad * 4)

    out = pl.pallas_call(
        functools.partial(_kernel, tq=TQ),
        out_shape=jax.ShapeDtypeStruct((Cout, Q_pad), jnp.float32),
        grid=(nT,),
        in_specs=[
            pl.BlockSpec((KKCa, 4 * TQ), lambda j: (0, j)),   # patch lane-tile
            pl.BlockSpec((Cout, KKCa), lambda j: (0, 0)),     # folded weights (resident)
        ],
        out_specs=pl.BlockSpec((Cout, TQ), lambda j: (0, j)),
        compiler_params=pltpu.CompilerParams(dimension_semantics=("parallel",)),
        cost_estimate=cost,
    )(patches_t, w_aug)

    # (Cout, Q_pad) -> drop lane padding -> (N, Cout, Ho, Wo) (NCHW, as PyTorch)
    return jnp.transpose(out[:, :Q].reshape(Cout, N, Ho, Wo), (1, 0, 2, 3))


def _reference(x, w, gamma, beta, mean, var, eps=1e-5):
    # pure-JAX f32 reference (NCHW, PyTorch semantics)
    y = lax.conv_general_dilated(
        x, w, window_strides=(1, 1), padding=[(1, 1), (1, 1)],
        dimension_numbers=('NCHW', 'OIHW', 'NCHW'),
        precision=lax.Precision.HIGHEST)
    y = (y - mean[None, :, None, None]) / jnp.sqrt(var + eps)[None, :, None, None]
    y = y * gamma[None, :, None, None] + beta[None, :, None, None]
    y = jnp.maximum(y, 0.0)
    N, C, H, W = y.shape
    return y.reshape(N, C, H // 2, 2, W // 2, 2).mean(axis=(3, 5))


if __name__ == "__main__":
    key = jax.random.PRNGKey(0)
    k_x, k_w, k_g, k_b, k_m, k_v = jax.random.split(key, 6)

    N, Cin, H, W = 2, 4, 16, 16
    Cout, KH, KW = 8, 3, 3

    x = jax.random.normal(k_x, (N, Cin, H, W), jnp.float32)
    w = jax.random.normal(k_w, (Cout, Cin, KH, KW), jnp.float32) * 0.1
    gamma = jax.random.uniform(k_g, (Cout,), jnp.float32, 0.5, 1.5)
    beta = jax.random.normal(k_b, (Cout,), jnp.float32) * 0.1
    running_mean = jax.random.normal(k_m, (Cout,), jnp.float32) * 0.1
    running_var = jax.random.uniform(k_v, (Cout,), jnp.float32, 0.5, 1.5)

    out = conv_norm_act_aa(x, w, gamma, beta, running_mean, running_var)
    out = jax.block_until_ready(out)

    ref = _reference(x, w, gamma, beta, running_mean, running_var)
    assert out.shape == (N, Cout, H // 2, W // 2), out.shape
    # tolerance loosened vs the f32 reference because MXU operands (and the folded
    # BN scale/shift constants) are bf16
    assert np.allclose(np.asarray(out), np.asarray(ref), atol=5e-2, rtol=5e-2)

    print("KERNEL_OK")
</pallas_src>

<mosaic_0001>
module attributes {stable_mosaic.version = 11 : i64} {
  func.func @_kernel(%arg0: i32, %arg1: memref<37x512xbf16, #tpu.memory_space<vmem>>, %arg2: memref<8x37xbf16, #tpu.memory_space<vmem>>, %arg3: memref<8x128xf32, #tpu.memory_space<vmem>>) attributes {dimension_semantics = [#tpu.dimension_semantics<parallel>], iteration_bounds = array<i64: 1>, scalar_prefetch = 0 : i64, scratch_operands = 0 : i64, tpu.core_type = #tpu.core_type<tc>, window_params = [{transform_indices = @transform_0, window_bounds = array<i64: 37, 512>}, {pipeline_mode = #tpu.pipeline_mode<synchronous>, transform_indices = @transform_1, window_bounds = array<i64: 8, 37>}, {transform_indices = @transform_2, window_bounds = array<i64: 8, 128>}]} {
    %c0 = arith.constant 0 : index
    %c0_0 = arith.constant 0 : index
    %0 = vector.load %arg2[%c0, %c0_0] : memref<8x37xbf16, #tpu.memory_space<vmem>>, vector<8x37xbf16>
    %c0_1 = arith.constant 0 : index
    %c0_2 = arith.constant 0 : index
    %1 = vector.load %arg1[%c0_1, %c0_2] : memref<37x512xbf16, #tpu.memory_space<vmem>>, vector<37x512xbf16>
    %cst = arith.constant dense<0.000000e+00> : vector<8x512xf32>
    %2 = tpu.matmul %0, %1, %cst {dimension_numbers = #tpu.dot_dimension_numbers<[1], [0], [0], [1], [0, 0, 1, 1], [], []>} : vector<8x37xbf16>, vector<37x512xbf16>, vector<8x512xf32> -> vector<8x512xf32>
    %cst_3 = arith.constant 0.000000e+00 : f32
    %3 = vector.broadcast %cst_3 : f32 to vector<8x512xf32>
    %4 = arith.maximumf %2, %3 : vector<8x512xf32>
    %5 = vector.extract_strided_slice %4 {offsets = [0, 0], sizes = [8, 128], strides = [1, 1]} : vector<8x512xf32> to vector<8x128xf32>
    %6 = vector.extract_strided_slice %4 {offsets = [0, 128], sizes = [8, 128], strides = [1, 1]} : vector<8x512xf32> to vector<8x128xf32>
    %7 = arith.addf %5, %6 : vector<8x128xf32>
    %8 = vector.extract_strided_slice %4 {offsets = [0, 256], sizes = [8, 128], strides = [1, 1]} : vector<8x512xf32> to vector<8x128xf32>
    %9 = arith.addf %7, %8 : vector<8x128xf32>
    %10 = vector.extract_strided_slice %4 {offsets = [0, 384], sizes = [8, 128], strides = [1, 1]} : vector<8x512xf32> to vector<8x128xf32>
    %11 = arith.addf %9, %10 : vector<8x128xf32>
    %c0_4 = arith.constant 0 : index
    %c0_5 = arith.constant 0 : index
    %12 = vector.load %arg3[%c0_4, %c0_5] : memref<8x128xf32, #tpu.memory_space<vmem>>, vector<8x128xf32>
    tpu.vector_store %arg3[%c0_4, %c0_5], %11 {strides = array<i32>} : memref<8x128xf32, #tpu.memory_space<vmem>>, vector<8x128xf32>,
    return
  }
  func.func @transform_0(%arg0: i32) -> (i32, i32) {
    %c0_i32 = arith.constant 0 : i32
    %c0_i32_0 = arith.constant 0 : i32
    return %c0_i32, %arg0 : i32, i32
  }
  func.func @transform_1(%arg0: i32) -> (i32, i32) {
    %c0_i32 = arith.constant 0 : i32
    %c0_i32_0 = arith.constant 0 : i32
    %c0_i32_1 = arith.constant 0 : i32
    return %c0_i32, %c0_i32_0 : i32, i32
  }
  func.func @transform_2(%arg0: i32) -> (i32, i32) {
    %c0_i32 = arith.constant 0 : i32
    %c0_i32_0 = arith.constant 0 : i32
    return %c0_i32, %arg0 : i32, i32
  }
}

</mosaic_0001>

<bundles_post_ra>
// kernel: conv_norm_act_aa.1
= control target key start
LH: loop header
LB: loop body
LE: loop exit
PB: predicated region body
PF: predicated region fallthrough
CT: control target
= control target key end

     0   :  { %vm77_vm0 = vcmask 1041408   ;;  %vm78_vm1 = vcmask 1042432   ;;  %v202_v1 = vmov 65535   ;;  %vm73_vm2 = vcmask 302080   ;;  %s278_s0 = inlined_call_operand.vmem [shape: bf16[37,512], index: 0, kind: input, shape index: {}]   ;;  %s279_s1 = inlined_call_operand.vmem [shape: bf16[8,37], index: 1, kind: input, shape index: {}]   ;;  %s280_s2 = inlined_call_operand.vmem [shape: f32[8,128], index: 2, kind: output, shape index: {}]  }
   0x1   :  { %v21_v0 = vld [vmem:[%s278_s0 + $0x40] sm:$0x77]  ;;  %v79_v2 = vsel %vm77_vm0, 4294967295, %v202_v1  ;;  %v22_v3 = vld [vmem:[%s278_s0 + $0x48] sm:$0x77] }
   0x2   :  { %v49_v4 = vunpack.c.l.b16 %v21_v0  ;;  %v50_v5 = vunpack.c.h.b16 %v21_v0  ;;  %v51_v6 = vunpack.c.l.b16 %v22_v3  ;;  %v80_v7 = vsel %vm78_vm1, %v79_v2, 0  ;;  %v175_v12 = vld [vmem:[%s278_s0 + $0x20] sm:$0xf]  ;;  %v199_v13 = vld [vmem:[%s278_s0 + $0x2c] sm:$0xf0] }
   0x3   :  { %v52_v8 = vunpack.c.h.b16 %v22_v3  ;;  %v197_v15 = vld [vmem:[%s278_s0 + $0x24] sm:$0xf]  ;;  %v177_v16 = vld [vmem:[%s278_s0 + $0x30] sm:$0xf0]  ;;  %v183_v17 = vld [vmem:[%s278_s0 + $0x28] sm:$0xf]  ;;  %v176_v25 = vor.u32 %v199_v13, %v175_v12 }
   0x4   :  { %v61_v9 = vpack.c.b16 %v49_v4, %v49_v4  ;;  %v62_v10 = vpack.c.b16 %v50_v5, %v50_v5  ;;  %v63_v11 = vpack.c.b16 %v51_v6, %v51_v6  ;;  %v200_v21 = vld [vmem:[%s278_s0 + $0x34] sm:$0xf0]  ;;  %v198_v22 = vld [vmem:[%s278_s0 + $0x2c] sm:$0xf]  ;;  %v185_v23 = vld [vmem:[%s278_s0 + $0x38] sm:$0xf0]  ;;  %v180_v26 = vor.u32 %v197_v15, %v177_v16 }
   0x5   :  { %v64_v14 = vpack.c.b16 %v52_v8, %v52_v8  ;;  %v159_v27 = vld [vmem:[%s278_s0] sm:$0xf]  ;;  %v195_v28 = vld [vmem:[%s278_s0 + $0xc] sm:$0xf0]  ;;  %v184_v29 = vor.u32 %v200_v21, %v183_v17  ;;  %v188_v30 = vor.u32 %v198_v22, %v185_v23  ;;  %v193_v31 = vld [vmem:[%s278_s0 + $0x4] sm:$0xf] }
   0x6   :  { %v82_v18 = vand.u32 %v80_v7, %v61_v9  ;;  %v85_v19 = vand.u32 %v80_v7, %v62_v10  ;;  %v88_v20 = vand.u32 %v80_v7, %v63_v11  ;;  %v161_v32 = vld [vmem:[%s278_s0 + $0x10] sm:$0xf0]  ;;  %v167_v33 = vld [vmem:[%s278_s0 + $0x8] sm:$0xf]  ;;  %v196_v34 = vld [vmem:[%s278_s0 + $0x14] sm:$0xf0]  ;;  %v160_v37 = vor.u32 %v195_v28, %v159_v27 }
   0x7   :  { %v91_v24 = vand.u32 %v80_v7, %v64_v14  ;;  %v194_v35 = vld [vmem:[%s278_s0 + $0xc] sm:$0xf]  ;;  %v169_v36 = vld [vmem:[%s278_s0 + $0x18] sm:$0xf0]  ;;  %v164_v38 = vor.u32 %v193_v31, %v161_v32  ;;  %v168_v39 = vor.u32 %v196_v34, %v167_v33  ;;  %v12_v41 = vld [vmem:[%s279_s1] sm:$0xf] }
   0x8   :  { %98 = vmatpush.bf16.msra.mxu0 %v82_v18  ;;  %111 = vmatpush.bf16.msra.mxu1 %v85_v19  ;;  %v172_v40 = vor.u32 %v194_v35, %v169_v36 }
   0x9   :  { %124 = vmatpush.bf16.msra.mxu2 %v88_v20  ;;  %137 = vmatpush.bf16.msra.mxu3 %v91_v24 }
   0xc   :  { %99 = vmatpush.bf16.msra.mxu0 %v176_v25  ;;  %112 = vmatpush.bf16.msra.mxu1 %v180_v26 }
   0xd   :  { %125 = vmatpush.bf16.msra.mxu2 %v184_v29  ;;  %138 = vmatpush.bf16.msra.mxu3 %v188_v30 }
  0x10   :  { %100 = vmatpush.bf16.msra.mxu0 %v160_v37  ;;  %113 = vmatpush.bf16.msra.mxu1 %v164_v38 }
  0x11   :  { %126 = vmatpush.bf16.msra.mxu2 %v168_v39  ;;  %139 = vmatpush.bf16.msra.mxu3 %v172_v40 }
  0x13   :  { %189 = vmatmul.msk.bf16.vlgmr.msra.gmra.mxu0 %vm73_vm2, %v12_v41  ;;  %190 = vmatmul.msk.bf16.vlgmr.msra.gmra.mxu1 %vm73_vm2, %v12_v41 }
  0x14   :  { %191 = vmatmul.msk.bf16.vlgmr.msra.gmra.mxu2 %vm73_vm2, %v12_v41  ;;  %192 = vmatmul.msk.bf16.vlgmr.msra.gmra.mxu3 %vm73_vm2, %v12_v41 }
  0x90   :  { %v102_v42 = vpop.f32.mrf.mxu0  ;;  %v115_v43 = vpop.f32.mrf.mxu1 }
  0x91   :  { %v145_v44 = vmax.f32 %v102_v42, 0.0  ;;  %v146_v45 = vmax.f32 %v115_v43, 0.0 }
  0x93   :  { %v149_v46 = vadd.f32 %v146_v45, %v145_v44 }
  0x97   :  { %v128_v47 = vpop.f32.mrf.mxu2  ;;  %v141_v48 = vpop.f32.mrf.mxu3 }
  0x98   :  { %v147_v49 = vmax.f32 %v128_v47, 0.0  ;;  %v104_v50 = vpop.f32.mrf.mxu0  ;;  %v117_v51 = vpop.f32.mrf.mxu1  ;;  %v148_v53 = vmax.f32 %v141_v48, 0.0 }
  0x9a   :  { %v150_v52 = vadd.f32 %v149_v46, %v147_v49 }
  0x9c   :  { %v151_v54 = vadd.f32 %v150_v52, %v148_v53 }
  0x9e   :  { %152 = vst [vmem:[%s280_s2] sm:$0xff] %v151_v54 }
  0x9f   :  { %v130_v55 = vpop.f32.mrf.mxu2  ;;  %v143_v56 = vpop.f32.mrf.mxu3 }

</bundles_post_ra>
